<compile_context>
chip_gen: v7x
topology: tpu7x:2x2x1
jax: 0.10.0
libtpu: 0.0.40
codegen_flags: <defaults>
</compile_context>

<pallas_src>
import functools

import jax
import jax.numpy as jnp
import numpy as np
from jax.experimental import pallas as pl
from jax.experimental.pallas import tpu as pltpu


# ----------------------------- host-side helpers -----------------------------

def _round_up(n, m):
    return ((n + m - 1) // m) * m


def _dft(n):
    """Real/imag parts of the n x n DFT matrix exp(-2*pi*i*j*k/n)."""
    idx = np.arange(n)
    w = np.exp(-2j * np.pi * np.outer(idx, idx) / n)
    return w.real.astype(np.float32), w.imag.astype(np.float32)


def _row_dft_packed(h):
    """Packed (2*Hp, H) row-DFT constant: [weighted real ; weighted imag].

    Rows are truncated to h//2+1 (real-input conjugate symmetry), the 2x
    symmetry weights are folded directly into the rows (|w*F| = w*|F|, w > 0),
    and each half is zero-padded to Hp = multiple of 8 so downstream slices
    stay sublane-aligned (padded rows give |0|-|0| = 0 contributions)."""
    hh = h // 2 + 1
    hp = _round_up(hh, 8)
    fr, fi = _dft(h)
    wgt = np.full((hh, 1), 2.0, np.float32)
    wgt[0, 0] = 1.0
    if h % 2 == 0:
        wgt[h // 2, 0] = 1.0
    out = np.zeros((2 * hp, h), np.float32)
    out[:hh] = wgt * fr[:hh]
    out[hp:hp + hh] = wgt * fi[:hh]
    return out, hp


def _col_dft_packed(w):
    """Packed (W, 2W) column-DFT constant [Fw_re | Fw_im]."""
    fr, fi = _dft(w)
    return np.concatenate([fr, fi], axis=1)


def _vmem_capacity_bytes():
    """Per-TensorCore VMEM capacity; conservative v7x fallback (64 MiB)."""
    try:
        info = pltpu.get_tpu_info()
        cap = int(getattr(info, "vmem_capacity_bytes", 0))
        if cap > 0:
            return cap
    except Exception:
        pass
    return 64 * 1024 * 1024


def _pick_block_batch(b, h, w, vmem_budget, const_bytes):
    """Largest divisor of B whose (TB, H, W) f32 block fits the VMEM budget
    (with a ~32x live-temporary multiplier), capped at a 4 MiB block and at
    B//2 so the parallel grid always has >= 2 steps (v7x megacore)."""
    best = 1
    limit = max(1, b // 2)
    for tb in range(1, limit + 1):
        if b % tb:
            continue
        blk = tb * h * w * 4
        if blk > 4 * 1024 * 1024 or tb * h > 4096 or tb > 32:
            break
        if const_bytes + 32 * blk > vmem_budget:
            break
        best = tb
    return best


# --------------------------------- kernel ------------------------------------

def _improved_loss_kernel(x_ref, y_ref, fh_ref, fw_ref, out_ref, *, freq_w, topo_w):
    TB, H, W = x_ref.shape
    Hp = fh_ref.shape[0] // 2          # padded truncated row-DFT row count
    B2 = 2 * TB

    x = x_ref[...]                     # (TB, H, W) f32 pred block
    y = y_ref[...]                     # (TB, H, W) f32 target block

    # ---- base criterion: MSE (sum of squared error; mean applied on host) ----
    d = x - y
    base_s = jnp.sum(d * d)

    # ---- frequency loss: | |FFT2(pred)| - |FFT2(target)| | via 2 big matmuls --
    xb = x.astype(jnp.bfloat16)
    yb = y.astype(jnp.bfloat16)
    # "wide" layout (H, B2*W): image b occupies lanes [b*W, (b+1)*W); pred
    # images first, then target images.  Built with static slices/concat only.
    zt = jnp.concatenate([xb[b] for b in range(TB)] +
                         [yb[b] for b in range(TB)], axis=1)          # (H, B2*W)

    # stage 1: truncated, weight-folded row DFT  ->  ONE matmul
    p = jnp.dot(fh_ref[...], zt,
                preferred_element_type=jnp.float32)                  # (2Hp, B2*W)

    # migrate batch from lanes to rows (static slices + concat): rows become
    # (component, image, row-freq) with the real component block first.
    p2 = jnp.concatenate(
        [p[:Hp, b * W:(b + 1) * W] for b in range(B2)] +
        [p[Hp:, b * W:(b + 1) * W] for b in range(B2)],
        axis=0).astype(jnp.bfloat16)                                  # (2*B2*Hp, W)

    # stage 2: full column DFT against packed [Fw_re | Fw_im]  ->  ONE matmul
    q = jnp.dot(p2, fw_ref[...],
                preferred_element_type=jnp.float32)                   # (2*B2*Hp, 2W)

    HB = B2 * Hp
    qr = q[:HB]                        # a_re @ [Fw_re | Fw_im]
    qi = q[HB:]                        # a_im @ [Fw_re | Fw_im]
    re = qr[:, :W] - qi[:, W:]
    im = qr[:, W:] + qi[:, :W]
    mag = jnp.sqrt(re * re + im * im)  # (B2*Hp, W), rows = (image, row-freq)
    PH = TB * Hp
    freq_s = jnp.sum(jnp.abs(mag[:PH] - mag[PH:]))

    # ---- topology loss: Sobel via pltpu.roll (XLU) + iota boundary masks ------
    R = TB * H
    x2 = x.reshape(R, W)
    y2 = y.reshape(R, W)
    ridx = jax.lax.broadcasted_iota(jnp.int32, (R, W), 0) % H
    cidx = jax.lax.broadcasted_iota(jnp.int32, (R, W), 1)
    not_top = ridx != 0
    not_bot = ridx != (H - 1)
    not_lft = cidx != 0
    not_rgt = cidx != (W - 1)

    def up(z):      # out[i] = z[i-1]; zero at each image's first row
        return jnp.where(not_top, pltpu.roll(z, 1, 0), 0.0)

    def down(z):    # out[i] = z[i+1]; zero at each image's last row
        return jnp.where(not_bot, pltpu.roll(z, R - 1, 0), 0.0)

    def left(z):    # out[:, j] = z[:, j+1]; zero at last column
        return jnp.where(not_rgt, pltpu.roll(z, W - 1, 1), 0.0)

    def right(z):   # out[:, j] = z[:, j-1]; zero at first column
        return jnp.where(not_lft, pltpu.roll(z, 1, 1), 0.0)

    def sobel(z):
        sv = up(z) + 2.0 * z + down(z)      # [1,2,1] along rows
        gx = left(sv) - right(sv)           # [-1,0,1] along cols
        sh = right(z) + 2.0 * z + left(z)   # [1,2,1] along cols
        gy = down(sh) - up(sh)              # [-1,0,1] along rows
        return gx, gy

    pgx, pgy = sobel(x2)
    tgx, tgy = sobel(y2)
    # contract gradients immediately so pgx/pgy/tgx/tgy die early (liveness)
    gp2 = pgx * pgx + pgy * pgy
    gt2 = tgx * tgx + tgy * tgy
    dotg = pgx * tgx + pgy * tgy
    den2 = gp2 * gt2
    wmin = jnp.sqrt(jnp.minimum(gp2, gt2))
    safe = den2 > 0.0
    # 1 - cos(theta_p - theta_t) == 1 - dotg * rsqrt(gp2*gt2); two-level guard
    # so no NaN leaks where both magnitudes (and hence wmin) are 0.
    cosd = jnp.where(safe, dotg * jax.lax.rsqrt(jnp.where(safe, den2, 1.0)), 1.0)
    topo_s = jnp.sum(wmin * (1.0 - cosd))

    partial = base_s + freq_w * freq_s + topo_w * topo_s
    out_ref[...] = jnp.full((1, 8, 128), partial, jnp.float32)


# -------------------------------- wrapper -------------------------------------

def improved_loss(pred, target, freq_weight=0.05, topo_weight=0.05):
    N, C, H, W = pred.shape
    assert C == 1, "Sobel conv weight is (1,1,3,3) -> single-channel input expected"
    B = N * C
    x = pred.reshape(B, H, W).astype(jnp.float32)
    y = target.reshape(B, H, W).astype(jnp.float32)

    fh_np, Hp = _row_dft_packed(H)        # (2*Hp, H)
    fw_np = _col_dft_packed(W)            # (W, 2W)
    fh = jnp.asarray(fh_np, dtype=jnp.bfloat16)
    fw = jnp.asarray(fw_np, dtype=jnp.bfloat16)
    const_bytes = (fh_np.size + fw_np.size) * 2

    vmem_cap = _vmem_capacity_bytes()
    budget = int(0.85 * vmem_cap)
    TB = _pick_block_batch(B, H, W, budget, const_bytes)
    G = B // TB
    block_bytes = TB * H * W * 4
    vmem_limit = int(min(budget,
                         max(32 * 2 ** 20,
                             const_bytes + 32 * block_bytes + (1 << 20))))

    img_spec = pl.BlockSpec((TB, H, W), lambda g: (g, 0, 0))
    # Whole-array, single-buffered VMEM residents (no per-step re-DMA of the
    # DFT constants).
    const_spec = pl.BlockSpec(memory_space=pltpu.MemorySpace.VMEM)

    kernel = functools.partial(_improved_loss_kernel,
                               freq_w=float(freq_weight),
                               topo_w=float(topo_weight))

    flops = int(B * (8 * Hp * H * W + 16 * Hp * W * W + 150 * H * W))
    transcend = int(B * (2 * Hp * W + 3 * H * W))
    bytes_accessed = int(2 * B * H * W * 4 + const_bytes + G * 8 * 128 * 4)

    partials = pl.pallas_call(
        kernel,
        out_shape=jax.ShapeDtypeStruct((G, 8, 128), jnp.float32),
        grid=(G,),
        in_specs=[img_spec, img_spec, const_spec, const_spec],
        out_specs=pl.BlockSpec((1, 8, 128), lambda g: (g, 0, 0)),
        compiler_params=pltpu.CompilerParams(
            dimension_semantics=("parallel",),
            vmem_limit_bytes=vmem_limit),
        cost_estimate=pl.CostEstimate(flops=flops,
                                      transcendentals=transcend,
                                      bytes_accessed=bytes_accessed),
    )(x, y, fh, fw)

    inv_total = 1.0 / float(B * H * W)
    return jnp.sum(partials[:, 0, 0]) * inv_total


# ------------------------------ pure-JAX reference ----------------------------

def _reference_loss(pred, target, freq_weight=0.05, topo_weight=0.05):
    base = jnp.mean((pred - target) ** 2)

    pf = jnp.abs(jnp.fft.fft2(pred))
    tf = jnp.abs(jnp.fft.fft2(target))
    freq = jnp.mean(jnp.abs(pf - tf))

    kx = jnp.array([[-1, 0, 1], [-2, 0, 2], [-1, 0, 1]], jnp.float32)[None, None]
    ky = jnp.array([[-1, -2, -1], [0, 0, 0], [1, 2, 1]], jnp.float32)[None, None]

    def conv(z, k):
        return jax.lax.conv_general_dilated(
            z, k, window_strides=(1, 1), padding="SAME",
            dimension_numbers=("NCHW", "OIHW", "NCHW"))

    pgx, pgy = conv(pred, kx), conv(pred, ky)
    tgx, tgy = conv(target, kx), conv(target, ky)
    pdir = jnp.arctan2(pgy, pgx)
    tdir = jnp.arctan2(tgy, tgx)
    ddiff = 1.0 - jnp.cos(pdir - tdir)
    pmag = jnp.sqrt(pgx ** 2 + pgy ** 2)
    tmag = jnp.sqrt(tgx ** 2 + tgy ** 2)
    topo = jnp.mean(ddiff * jnp.minimum(pmag, tmag))

    return base + freq_weight * freq + topo_weight * topo


# ---------------------------------- main ---------------------------------------

if __name__ == "__main__":
    key = jax.random.PRNGKey(0)
    k1, k2 = jax.random.split(key)
    pred = jax.random.normal(k1, (2, 1, 16, 16), dtype=jnp.float32)
    target = jax.random.normal(k2, (2, 1, 16, 16), dtype=jnp.float32)

    loss = improved_loss(pred, target)
    jax.block_until_ready(loss)

    ref = _reference_loss(pred, target)
    np.testing.assert_allclose(np.asarray(loss), np.asarray(ref),
                               rtol=2e-2, atol=2e-2)

    print("KERNEL_OK")
</pallas_src>

<mosaic_0001>
module attributes {stable_mosaic.version = 11 : i64} {
  func.func @_improved_loss_kernel(%arg0: i32, %arg1: memref<1x16x16xf32, #tpu.memory_space<vmem>>, %arg2: memref<1x16x16xf32, #tpu.memory_space<vmem>>, %arg3: memref<32x16xbf16, #tpu.memory_space<vmem>>, %arg4: memref<16x32xbf16, #tpu.memory_space<vmem>>, %arg5: memref<1x8x128xf32, #tpu.memory_space<vmem>>) attributes {dimension_semantics = [#tpu.dimension_semantics<parallel>], iteration_bounds = array<i64: 2>, scalar_prefetch = 0 : i64, scratch_operands = 0 : i64, tpu.core_type = #tpu.core_type<tc>, window_params = [{transform_indices = @transform_0, window_bounds = array<i64: 1, 16, 16>}, {transform_indices = @transform_1, window_bounds = array<i64: 1, 16, 16>}, {pipeline_mode = #tpu.pipeline_mode<synchronous>, transform_indices = @transform_2, window_bounds = array<i64: 32, 16>}, {pipeline_mode = #tpu.pipeline_mode<synchronous>, transform_indices = @transform_3, window_bounds = array<i64: 16, 32>}, {transform_indices = @transform_4, window_bounds = array<i64: 1, 8, 128>}]} {
    %c0 = arith.constant 0 : index
    %c0_0 = arith.constant 0 : index
    %c0_1 = arith.constant 0 : index
    %0 = vector.load %arg1[%c0, %c0_0, %c0_1] : memref<1x16x16xf32, #tpu.memory_space<vmem>>, vector<1x16x16xf32>
    %c0_2 = arith.constant 0 : index
    %c0_3 = arith.constant 0 : index
    %c0_4 = arith.constant 0 : index
    %1 = vector.load %arg2[%c0_2, %c0_3, %c0_4] : memref<1x16x16xf32, #tpu.memory_space<vmem>>, vector<1x16x16xf32>
    %2 = arith.subf %0, %1 : vector<1x16x16xf32>
    %3 = arith.mulf %2, %2 : vector<1x16x16xf32>
    %4 = vector.shape_cast %3 : vector<1x16x16xf32> to vector<1x1x16x16xf32>
    %cst = arith.constant dense<0.000000e+00> : vector<1xf32>
    %5 = vector.multi_reduction <add>, %4, %cst [1, 2, 3] : vector<1x1x16x16xf32> to vector<1xf32>
    %6 = vector.shape_cast %5 : vector<1xf32> to vector<1x1x1x1xf32>
    %7 = vector.extract %6[0, 0, 0, 0] : f32 from vector<1x1x1x1xf32>
    %8 = arith.truncf %0 : vector<1x16x16xf32> to vector<1x16x16xbf16>
    %9 = arith.truncf %1 : vector<1x16x16xf32> to vector<1x16x16xbf16>
    %10 = vector.shape_cast %8 : vector<1x16x16xbf16> to vector<16x16xbf16>
    %11 = vector.shape_cast %9 : vector<1x16x16xbf16> to vector<16x16xbf16>
    %12 = tpu.concatenate %10, %11 in 1 : vector<16x16xbf16>, vector<16x16xbf16> -> vector<16x32xbf16>
    %c0_5 = arith.constant 0 : index
    %c0_6 = arith.constant 0 : index
    %13 = vector.load %arg3[%c0_5, %c0_6] : memref<32x16xbf16, #tpu.memory_space<vmem>>, vector<32x16xbf16>
    %cst_7 = arith.constant dense<0.000000e+00> : vector<32x32xf32>
    %14 = tpu.matmul %13, %12, %cst_7 {dimension_numbers = #tpu.dot_dimension_numbers<[1], [0], [0], [1], [0, 0, 1, 1], [], []>} : vector<32x16xbf16>, vector<16x32xbf16>, vector<32x32xf32> -> vector<32x32xf32>
    %15 = vector.extract_strided_slice %14 {offsets = [0, 0], sizes = [16, 16], strides = [1, 1]} : vector<32x32xf32> to vector<16x16xf32>
    %16 = vector.extract_strided_slice %14 {offsets = [0, 16], sizes = [16, 16], strides = [1, 1]} : vector<32x32xf32> to vector<16x16xf32>
    %17 = vector.extract_strided_slice %14 {offsets = [16, 0], sizes = [16, 16], strides = [1, 1]} : vector<32x32xf32> to vector<16x16xf32>
    %18 = vector.extract_strided_slice %14 {offsets = [16, 16], sizes = [16, 16], strides = [1, 1]} : vector<32x32xf32> to vector<16x16xf32>
    %19 = tpu.concatenate %15, %16, %17, %18 in 0 : vector<16x16xf32>, vector<16x16xf32>, vector<16x16xf32>, vector<16x16xf32> -> vector<64x16xf32>
    %20 = arith.truncf %19 : vector<64x16xf32> to vector<64x16xbf16>
    %c0_8 = arith.constant 0 : index
    %c0_9 = arith.constant 0 : index
    %21 = vector.load %arg4[%c0_8, %c0_9] : memref<16x32xbf16, #tpu.memory_space<vmem>>, vector<16x32xbf16>
    %cst_10 = arith.constant dense<0.000000e+00> : vector<64x32xf32>
    %22 = tpu.matmul %20, %21, %cst_10 {dimension_numbers = #tpu.dot_dimension_numbers<[1], [0], [0], [1], [0, 0, 1, 1], [], []>} : vector<64x16xbf16>, vector<16x32xbf16>, vector<64x32xf32> -> vector<64x32xf32>
    %23 = vector.extract_strided_slice %22 {offsets = [0, 0], sizes = [32, 32], strides = [1, 1]} : vector<64x32xf32> to vector<32x32xf32>
    %24 = vector.extract_strided_slice %22 {offsets = [32, 0], sizes = [32, 32], strides = [1, 1]} : vector<64x32xf32> to vector<32x32xf32>
    %25 = vector.extract_strided_slice %23 {offsets = [0, 0], sizes = [32, 16], strides = [1, 1]} : vector<32x32xf32> to vector<32x16xf32>
    %26 = vector.extract_strided_slice %24 {offsets = [0, 16], sizes = [32, 16], strides = [1, 1]} : vector<32x32xf32> to vector<32x16xf32>
    %27 = arith.subf %25, %26 : vector<32x16xf32>
    %28 = vector.extract_strided_slice %23 {offsets = [0, 16], sizes = [32, 16], strides = [1, 1]} : vector<32x32xf32> to vector<32x16xf32>
    %29 = vector.extract_strided_slice %24 {offsets = [0, 0], sizes = [32, 16], strides = [1, 1]} : vector<32x32xf32> to vector<32x16xf32>
    %30 = arith.addf %28, %29 : vector<32x16xf32>
    %31 = arith.mulf %27, %27 : vector<32x16xf32>
    %32 = arith.mulf %30, %30 : vector<32x16xf32>
    %33 = arith.addf %31, %32 : vector<32x16xf32>
    %34 = math.sqrt %33 : vector<32x16xf32>
    %35 = vector.extract_strided_slice %34 {offsets = [0, 0], sizes = [16, 16], strides = [1, 1]} : vector<32x16xf32> to vector<16x16xf32>
    %36 = vector.extract_strided_slice %34 {offsets = [16, 0], sizes = [16, 16], strides = [1, 1]} : vector<32x16xf32> to vector<16x16xf32>
    %37 = arith.subf %35, %36 : vector<16x16xf32>
    %38 = math.absf %37 : vector<16x16xf32>
    %39 = vector.shape_cast %38 : vector<16x16xf32> to vector<1x16x16xf32>
    %cst_11 = arith.constant dense<0.000000e+00> : vector<1xf32>
    %40 = vector.multi_reduction <add>, %39, %cst_11 [1, 2] : vector<1x16x16xf32> to vector<1xf32>
    %41 = vector.shape_cast %40 : vector<1xf32> to vector<1x1x1xf32>
    %42 = vector.extract %41[0, 0, 0] : f32 from vector<1x1x1xf32>
    %43 = vector.shape_cast %0 : vector<1x16x16xf32> to vector<16x16xf32>
    %44 = vector.shape_cast %1 : vector<1x16x16xf32> to vector<16x16xf32>
    %45 = tpu.iota {dimensions = array<i32: 0>} : vector<16x16xi32>
    %c16_i32 = arith.constant 16 : i32
    %c0_i32 = arith.constant 0 : i32
    %46 = arith.cmpi eq, %c16_i32, %c0_i32 : i32
    %c1_i32 = arith.constant 1 : i32
    %47 = arith.select %46, %c1_i32, %c16_i32 : i32
    %48 = vector.broadcast %47 : i32 to vector<16x16xi32>
    %49 = arith.remsi %45, %48 : vector<16x16xi32>
    %c0_i32_12 = arith.constant 0 : i32
    %50 = vector.broadcast %c0_i32_12 : i32 to vector<16x16xi32>
    %51 = arith.cmpi ne, %49, %50 : vector<16x16xi32>
    %c0_i32_13 = arith.constant 0 : i32
    %52 = vector.broadcast %c0_i32_13 : i32 to vector<16x16xi32>
    %53 = arith.cmpi slt, %49, %52 : vector<16x16xi32>
    %c0_i32_14 = arith.constant 0 : i32
    %54 = arith.cmpi slt, %47, %c0_i32_14 : i32
    %55 = vector.broadcast %54 : i1 to vector<16x16xi1>
    %56 = vector.broadcast %55 : vector<16x16xi1> to vector<16x16xi1>
    %57 = arith.xori %53, %56 : vector<16x16xi1>
    %58 = arith.andi %57, %51 : vector<16x16xi1>
    %59 = vector.broadcast %47 : i32 to vector<16x16xi32>
    %60 = arith.addi %49, %59 : vector<16x16xi32>
    %61 = arith.select %58, %60, %49 : vector<16x16xi1>, vector<16x16xi32>
    %62 = tpu.iota {dimensions = array<i32: 1>} : vector<16x16xi32>
    %c0_i32_15 = arith.constant 0 : i32
    %63 = vector.broadcast %c0_i32_15 : i32 to vector<16x16xi32>
    %64 = arith.cmpi ne, %61, %63 : vector<16x16xi32>
    %c15_i32 = arith.constant 15 : i32
    %65 = vector.broadcast %c15_i32 : i32 to vector<16x16xi32>
    %66 = arith.cmpi ne, %61, %65 : vector<16x16xi32>
    %c0_i32_16 = arith.constant 0 : i32
    %67 = vector.broadcast %c0_i32_16 : i32 to vector<16x16xi32>
    %68 = arith.cmpi ne, %62, %67 : vector<16x16xi32>
    %c15_i32_17 = arith.constant 15 : i32
    %69 = vector.broadcast %c15_i32_17 : i32 to vector<16x16xi32>
    %70 = arith.cmpi ne, %62, %69 : vector<16x16xi32>
    %c1_i32_18 = arith.constant 1 : i32
    %71 = tpu.dynamic_rotate %43 by %c1_i32_18 dim 0 : vector<16x16xf32>, i32 -> vector<16x16xf32>
    %cst_19 = arith.constant 0.000000e+00 : f32
    %72 = vector.broadcast %cst_19 : f32 to vector<16x16xf32>
    %73 = arith.select %64, %71, %72 : vector<16x16xi1>, vector<16x16xf32>
    %cst_20 = arith.constant 2.000000e+00 : f32
    %74 = vector.broadcast %cst_20 : f32 to vector<16x16xf32>
    %75 = arith.mulf %74, %43 : vector<16x16xf32>
    %76 = arith.addf %73, %75 : vector<16x16xf32>
    %c15_i32_21 = arith.constant 15 : i32
    %77 = tpu.dynamic_rotate %43 by %c15_i32_21 dim 0 : vector<16x16xf32>, i32 -> vector<16x16xf32>
    %cst_22 = arith.constant 0.000000e+00 : f32
    %78 = vector.broadcast %cst_22 : f32 to vector<16x16xf32>
    %79 = arith.select %66, %77, %78 : vector<16x16xi1>, vector<16x16xf32>
    %80 = arith.addf %76, %79 : vector<16x16xf32>
    %c15_i32_23 = arith.constant 15 : i32
    %81 = tpu.dynamic_rotate %80 by %c15_i32_23 dim 1 : vector<16x16xf32>, i32 -> vector<16x16xf32>
    %cst_24 = arith.constant 0.000000e+00 : f32
    %82 = vector.broadcast %cst_24 : f32 to vector<16x16xf32>
    %83 = arith.select %70, %81, %82 : vector<16x16xi1>, vector<16x16xf32>
    %c1_i32_25 = arith.constant 1 : i32
    %84 = tpu.dynamic_rotate %80 by %c1_i32_25 dim 1 : vector<16x16xf32>, i32 -> vector<16x16xf32>
    %cst_26 = arith.constant 0.000000e+00 : f32
    %85 = vector.broadcast %cst_26 : f32 to vector<16x16xf32>
    %86 = arith.select %68, %84, %85 : vector<16x16xi1>, vector<16x16xf32>
    %87 = arith.subf %83, %86 : vector<16x16xf32>
    %c1_i32_27 = arith.constant 1 : i32
    %88 = tpu.dynamic_rotate %43 by %c1_i32_27 dim 1 : vector<16x16xf32>, i32 -> vector<16x16xf32>
    %cst_28 = arith.constant 0.000000e+00 : f32
    %89 = vector.broadcast %cst_28 : f32 to vector<16x16xf32>
    %90 = arith.select %68, %88, %89 : vector<16x16xi1>, vector<16x16xf32>
    %cst_29 = arith.constant 2.000000e+00 : f32
    %91 = vector.broadcast %cst_29 : f32 to vector<16x16xf32>
    %92 = arith.mulf %91, %43 : vector<16x16xf32>
    %93 = arith.addf %90, %92 : vector<16x16xf32>
    %c15_i32_30 = arith.constant 15 : i32
    %94 = tpu.dynamic_rotate %43 by %c15_i32_30 dim 1 : vector<16x16xf32>, i32 -> vector<16x16xf32>
    %cst_31 = arith.constant 0.000000e+00 : f32
    %95 = vector.broadcast %cst_31 : f32 to vector<16x16xf32>
    %96 = arith.select %70, %94, %95 : vector<16x16xi1>, vector<16x16xf32>
    %97 = arith.addf %93, %96 : vector<16x16xf32>
    %c15_i32_32 = arith.constant 15 : i32
    %98 = tpu.dynamic_rotate %97 by %c15_i32_32 dim 0 : vector<16x16xf32>, i32 -> vector<16x16xf32>
    %cst_33 = arith.constant 0.000000e+00 : f32
    %99 = vector.broadcast %cst_33 : f32 to vector<16x16xf32>
    %100 = arith.select %66, %98, %99 : vector<16x16xi1>, vector<16x16xf32>
    %c1_i32_34 = arith.constant 1 : i32
    %101 = tpu.dynamic_rotate %97 by %c1_i32_34 dim 0 : vector<16x16xf32>, i32 -> vector<16x16xf32>
    %cst_35 = arith.constant 0.000000e+00 : f32
    %102 = vector.broadcast %cst_35 : f32 to vector<16x16xf32>
    %103 = arith.select %64, %101, %102 : vector<16x16xi1>, vector<16x16xf32>
    %104 = arith.subf %100, %103 : vector<16x16xf32>
    %c1_i32_36 = arith.constant 1 : i32
    %105 = tpu.dynamic_rotate %44 by %c1_i32_36 dim 0 : vector<16x16xf32>, i32 -> vector<16x16xf32>
    %cst_37 = arith.constant 0.000000e+00 : f32
    %106 = vector.broadcast %cst_37 : f32 to vector<16x16xf32>
    %107 = arith.select %64, %105, %106 : vector<16x16xi1>, vector<16x16xf32>
    %cst_38 = arith.constant 2.000000e+00 : f32
    %108 = vector.broadcast %cst_38 : f32 to vector<16x16xf32>
    %109 = arith.mulf %108, %44 : vector<16x16xf32>
    %110 = arith.addf %107, %109 : vector<16x16xf32>
    %c15_i32_39 = arith.constant 15 : i32
    %111 = tpu.dynamic_rotate %44 by %c15_i32_39 dim 0 : vector<16x16xf32>, i32 -> vector<16x16xf32>
    %cst_40 = arith.constant 0.000000e+00 : f32
    %112 = vector.broadcast %cst_40 : f32 to vector<16x16xf32>
    %113 = arith.select %66, %111, %112 : vector<16x16xi1>, vector<16x16xf32>
    %114 = arith.addf %110, %113 : vector<16x16xf32>
    %c15_i32_41 = arith.constant 15 : i32
    %115 = tpu.dynamic_rotate %114 by %c15_i32_41 dim 1 : vector<16x16xf32>, i32 -> vector<16x16xf32>
    %cst_42 = arith.constant 0.000000e+00 : f32
    %116 = vector.broadcast %cst_42 : f32 to vector<16x16xf32>
    %117 = arith.select %70, %115, %116 : vector<16x16xi1>, vector<16x16xf32>
    %c1_i32_43 = arith.constant 1 : i32
    %118 = tpu.dynamic_rotate %114 by %c1_i32_43 dim 1 : vector<16x16xf32>, i32 -> vector<16x16xf32>
    %cst_44 = arith.constant 0.000000e+00 : f32
    %119 = vector.broadcast %cst_44 : f32 to vector<16x16xf32>
    %120 = arith.select %68, %118, %119 : vector<16x16xi1>, vector<16x16xf32>
    %121 = arith.subf %117, %120 : vector<16x16xf32>
    %c1_i32_45 = arith.constant 1 : i32
    %122 = tpu.dynamic_rotate %44 by %c1_i32_45 dim 1 : vector<16x16xf32>, i32 -> vector<16x16xf32>
    %cst_46 = arith.constant 0.000000e+00 : f32
    %123 = vector.broadcast %cst_46 : f32 to vector<16x16xf32>
    %124 = arith.select %68, %122, %123 : vector<16x16xi1>, vector<16x16xf32>
    %cst_47 = arith.constant 2.000000e+00 : f32
    %125 = vector.broadcast %cst_47 : f32 to vector<16x16xf32>
    %126 = arith.mulf %125, %44 : vector<16x16xf32>
    %127 = arith.addf %124, %126 : vector<16x16xf32>
    %c15_i32_48 = arith.constant 15 : i32
    %128 = tpu.dynamic_rotate %44 by %c15_i32_48 dim 1 : vector<16x16xf32>, i32 -> vector<16x16xf32>
    %cst_49 = arith.constant 0.000000e+00 : f32
    %129 = vector.broadcast %cst_49 : f32 to vector<16x16xf32>
    %130 = arith.select %70, %128, %129 : vector<16x16xi1>, vector<16x16xf32>
    %131 = arith.addf %127, %130 : vector<16x16xf32>
    %c15_i32_50 = arith.constant 15 : i32
    %132 = tpu.dynamic_rotate %131 by %c15_i32_50 dim 0 : vector<16x16xf32>, i32 -> vector<16x16xf32>
    %cst_51 = arith.constant 0.000000e+00 : f32
    %133 = vector.broadcast %cst_51 : f32 to vector<16x16xf32>
    %134 = arith.select %66, %132, %133 : vector<16x16xi1>, vector<16x16xf32>
    %c1_i32_52 = arith.constant 1 : i32
    %135 = tpu.dynamic_rotate %131 by %c1_i32_52 dim 0 : vector<16x16xf32>, i32 -> vector<16x16xf32>
    %cst_53 = arith.constant 0.000000e+00 : f32
    %136 = vector.broadcast %cst_53 : f32 to vector<16x16xf32>
    %137 = arith.select %64, %135, %136 : vector<16x16xi1>, vector<16x16xf32>
    %138 = arith.subf %134, %137 : vector<16x16xf32>
    %139 = arith.mulf %87, %87 : vector<16x16xf32>
    %140 = arith.mulf %104, %104 : vector<16x16xf32>
    %141 = arith.addf %139, %140 : vector<16x16xf32>
    %142 = arith.mulf %121, %121 : vector<16x16xf32>
    %143 = arith.mulf %138, %138 : vector<16x16xf32>
    %144 = arith.addf %142, %143 : vector<16x16xf32>
    %145 = arith.mulf %87, %121 : vector<16x16xf32>
    %146 = arith.mulf %104, %138 : vector<16x16xf32>
    %147 = arith.addf %145, %146 : vector<16x16xf32>
    %148 = arith.mulf %141, %144 : vector<16x16xf32>
    %149 = arith.minimumf %141, %144 : vector<16x16xf32>
    %150 = math.sqrt %149 : vector<16x16xf32>
    %cst_54 = arith.constant 0.000000e+00 : f32
    %151 = vector.broadcast %cst_54 : f32 to vector<16x16xf32>
    %152 = arith.cmpf ogt, %148, %151 : vector<16x16xf32>
    %cst_55 = arith.constant 1.000000e+00 : f32
    %153 = vector.broadcast %cst_55 : f32 to vector<16x16xf32>
    %154 = arith.select %152, %148, %153 : vector<16x16xi1>, vector<16x16xf32>
    %155 = math.rsqrt %154 : vector<16x16xf32>
    %156 = arith.mulf %147, %155 : vector<16x16xf32>
    %cst_56 = arith.constant 1.000000e+00 : f32
    %157 = vector.broadcast %cst_56 : f32 to vector<16x16xf32>
    %158 = arith.select %152, %156, %157 : vector<16x16xi1>, vector<16x16xf32>
    %cst_57 = arith.constant 1.000000e+00 : f32
    %159 = vector.broadcast %cst_57 : f32 to vector<16x16xf32>
    %160 = arith.subf %159, %158 : vector<16x16xf32>
    %161 = arith.mulf %150, %160 : vector<16x16xf32>
    %162 = vector.shape_cast %161 : vector<16x16xf32> to vector<1x16x16xf32>
    %cst_58 = arith.constant dense<0.000000e+00> : vector<1xf32>
    %163 = vector.multi_reduction <add>, %162, %cst_58 [1, 2] : vector<1x16x16xf32> to vector<1xf32>
    %164 = vector.shape_cast %163 : vector<1xf32> to vector<1x1x1xf32>
    %165 = vector.extract %164[0, 0, 0] : f32 from vector<1x1x1xf32>
    %cst_59 = arith.constant 5.000000e-02 : f32
    %166 = arith.mulf %cst_59, %42 : f32
    %167 = arith.addf %7, %166 : f32
    %cst_60 = arith.constant 5.000000e-02 : f32
    %168 = arith.mulf %cst_60, %165 : f32
    %169 = arith.addf %167, %168 : f32
    %170 = vector.broadcast %169 : f32 to vector<1x8x128xf32>
    %c0_61 = arith.constant 0 : index
    %c0_62 = arith.constant 0 : index
    %c0_63 = arith.constant 0 : index
    %171 = vector.load %arg5[%c0_61, %c0_62, %c0_63] : memref<1x8x128xf32, #tpu.memory_space<vmem>>, vector<1x8x128xf32>
    tpu.vector_store %arg5[%c0_61, %c0_62, %c0_63], %170 {strides = array<i32>} : memref<1x8x128xf32, #tpu.memory_space<vmem>>, vector<1x8x128xf32>,
    return
  }
  func.func @transform_0(%arg0: i32) -> (i32, i32, i32) {
    %c0_i32 = arith.constant 0 : i32
    %c0_i32_0 = arith.constant 0 : i32
    %c0_i32_1 = arith.constant 0 : i32
    return %arg0, %c0_i32, %c0_i32_0 : i32, i32, i32
  }
  func.func @transform_1(%arg0: i32) -> (i32, i32, i32) {
    %c0_i32 = arith.constant 0 : i32
    %c0_i32_0 = arith.constant 0 : i32
    %c0_i32_1 = arith.constant 0 : i32
    return %arg0, %c0_i32, %c0_i32_0 : i32, i32, i32
  }
  func.func @transform_2(%arg0: i32) -> (i32, i32) {
    %c0_i32 = arith.constant 0 : i32
    %c0_i32_0 = arith.constant 0 : i32
    %c0_i32_1 = arith.constant 0 : i32
    return %c0_i32, %c0_i32_0 : i32, i32
  }
  func.func @transform_3(%arg0: i32) -> (i32, i32) {
    %c0_i32 = arith.constant 0 : i32
    %c0_i32_0 = arith.constant 0 : i32
    %c0_i32_1 = arith.constant 0 : i32
    return %c0_i32, %c0_i32_0 : i32, i32
  }
  func.func @transform_4(%arg0: i32) -> (i32, i32, i32) {
    %c0_i32 = arith.constant 0 : i32
    %c0_i32_0 = arith.constant 0 : i32
    %c0_i32_1 = arith.constant 0 : i32
    return %arg0, %c0_i32, %c0_i32_0 : i32, i32, i32
  }
}

</mosaic_0001>

<bundles_post_ra>
// kernel: tpu_custom_call.1
= control target key start
LH: loop header
LB: loop body
LE: loop exit
PB: predicated region body
PF: predicated region fallthrough
CT: control target
= control target key end

     0   :  { %9 = vsyncpa [#allocation3], 0  ;;  %s1786_s0 = inlined_call_operand.hbm [shape: f32[2,16,16], index: 0, kind: input, shape index: {}]   ;;  %s1787_s1 = inlined_call_operand.hbm [shape: f32[2,16,16], index: 1, kind: input, shape index: {}]   ;;  %s1788_s2 = inlined_call_operand.vmem [shape: bf16[32,16], index: 2, kind: input, shape index: {}]   ;;  %s1789_s3 = inlined_call_operand.vmem [shape: bf16[16,32], index: 3, kind: input, shape index: {}]   ;;  %s1790_s4 = inlined_call_operand.hbm [shape: f32[2,8,128], index: 4, kind: output, shape index: {}]  }
   0x1   :  { %11 = vsyncpa [#allocation3 + $0x1], 0 }
   0x2   :  { %12 = vsyncpa [#allocation6], 0 }
   0x3   :  { %14 = vsyncpa [#allocation6 + $0x1], 0 }
   0x4   :  { %15 = vsyncpa [#allocation4], 0 }
   0x5   :  { %17 = vsyncpa [#allocation4 + $0x1], 0  ;;  %s1288_s15 = smov 0   ;;  %s1290_s16 = smov 0  }
   0x6   :  { %s1292_s17 = smov 0   ;;  %s1294_s18 = smov 0  }
   0x7 LB: > { %s1309_s19 = sadd.s32 4294967295, %s1252_s18   ;;  %s978_s20 = sadd.s32 4294967294, %s1252_s18   ;;  %s1252_s18 = sphi %s1294_s18, %s1810_s18   ;;  %s1248_s17 = sphi %s1292_s17, %s1809_s17   ;;  %s1244_s16 = sphi %s1290_s16, %s1808_s16   ;;  %s1240_s15 = sphi %s1288_s15, %s1807_s15  }
   0x8   : > { %s1313_s21 = sadd.s32 1, %s1252_s18   ;;  %s30_s22 = sadd.s32 1, %s1248_s17 }
   0x9   : > { %s27_s23 = ssub.s32 %s1252_s18, %s1313_s21  ;;  %p37_p0 = scmp.ne.s32.totalorder %s1248_s17, %s1244_s16 }
   0xa   : > { %p28_p1 = scmp.eq.s32.totalorder %s27_s23, 0  ;;  %p38_p2 = scmp.eq.s32.totalorder %s1252_s18, 0 }
   0xb   : > { %p43_p3 = scmp.ne.s32.totalorder %s1244_s16, %s1240_s15  ;;  %p44_p4 = scmp.eq.s32.totalorder %s1309_s19, 0 }
   0xc   : > { %s1325_s24 = scalar_select %p28_p1, %s1248_s17, %s30_s22  }
   0xd   : > { %p1327_p5 = por %p38_p2, %p37_p0  ;;  %p1331_p6 = por %p44_p4, %p43_p3 }
   0xe   : > { %p135_p7 = scmp.eq.s32.totalorder %s1309_s19, 1  ;;  %p141_p8 = scmp.eq.s32.totalorder %s978_s20, 1 }
   0xf   : > { %s1794_s26 = scalar_select %p1331_p6, 1, 0 }
  0x10   : > { %p1053_p10 = scmp.lt.s32.totalorder %s1252_s18, 2  ;;  %p1338_p11 = por %p135_p7, %p37_p0 }
  0x11   : > { %p1342_p12 = por %p141_p8, %p43_p3  ;;  %s1347_s29 = sand.u32 1, %s1248_s17  }
  0x12   : > { %s1795_s27 = scalar_select %p1338_p11, 1, 0 }
  0x13   : > { %s1796_s28 = scalar_select %p1342_p12, 1, 0 }
  0x14   : > { %s1004_s30 = sshll.u32 %s1252_s18, 8  ;;  %s981_s5 = sshll.u32 %s1347_s29, 4 }
  0x15   : > { %s1356_s8 = scalar_lea.hbm %s1786_s0, %s1004_s30  ;;  %s171_s9 = scalar_lea.vmem [#allocation2], %s981_s5 }
  0x16   : > { %s178_s10 = sshll.u32 %s171_s9, 4  ;;  %p1362_p13 = pnand %p1053_p10, %p1327_p5  ;;  %s1366_s10 = int_to_ptr.vmem [resolvable:$true] %s178_s10 }
  0x17   : > { %s168_s12 = scalar_lea.sflag [#allocation3], %s1347_s29  ;;  %s1122_s13 = scalar_lea.hbm %s1356_s8, 256 }
  0x18   : > { %p1123_p0 = scmp.ne.s32.totalorder %s1356_s8, %s1122_s13  ;;  %p1124_p1 = pneg %p1362_p13 }
  0x19   : > { %s1127_s22 = scalar_lea.hbm %s1786_s0, 512  ;;  %p1128_p4 = scmp.lt.u32.totalorder %s1356_s8, %s1786_s0 }
  0x1a   : > { %p1125_p2 = pnand %p1124_p1, %p1123_p0  ;;  %p1129_p5 = scmp.lt.u32.totalorder %s1127_s22, %s1122_s13 }
  0x1b   : > { %p1131_p8 = scmp.lt.u32.totalorder %s1122_s13, %s1356_s8 }
  0x1c   : > { %p1126_p3 = pneg %p1125_p2  ;;  %p1130_p7 = por %p1129_p5, %p1128_p4 }
  0x1e   : > { %p1132_p10 = por %p1131_p8, %p1130_p7 }
  0x20   : > { %p1133_p9 = pnand %p1132_p10, %p1126_p3 }
  0x22   : > { %1136 = shalt.err (!%p1133_p9)
}
  0x23   : > { %s1137_s6 = scalar_lea.vmem %s1366_s10, 256  ;;  %s1254_s7 = smov [#allocation2]  }
  0x24   : > { %p1138_p0 = scmp.ne.s32.totalorder %s1366_s10, %s1137_s6  ;;  %s1142_s9 = sshll.u32 %s1254_s7, 4  ;;  %s1143_s9 = int_to_ptr.vmem [resolvable:$false] %s1142_s9 }
  0x25   : > { %s1144_s14 = scalar_lea.vmem %s1143_s9, 512  ;;  %p1145_p11 = scmp.lt.s32.totalorder %s1366_s10, %s1143_s9 }
  0x26   : > { %p1140_p2 = pnand %p1138_p0, %p1124_p1  ;;  %p1146_p4 = scmp.lt.s32.totalorder %s1144_s14, %s1137_s6 }
  0x28   : > { %p1141_p12 = pneg %p1140_p2  ;;  %p1147_p5 = por %p1146_p4, %p1145_p11 }
  0x2a   : > { %p1148_p7 = pnand %p1147_p5, %p1141_p12 }
  0x2c   : > { %1151 = shalt.err (!%p1148_p7)
}
  0x2d   : > { %s1255_s13 = smov 128   ;;  %s1256_s20 = smov 8  }
  0x2e   : > { %1045 = dma.hbm_to_vmem [thread:$0]  (!%p1362_p13), %s1356_s8, 256, %s1366_s10, %s168_s12, %s1255_s13, %s1255_s13, %s1256_s20  }
  0x2f   : > { %p987_p9 = scmp.ge.s32.totalorder %s1252_s18, 1  ;;  %p207_p11 = scmp.lt.s32.totalorder %s1252_s18, 3 }
  0x30   : > { %s1410_s6 = scalar_lea.hbm %s1787_s1, %s1004_s30  ;;  %s192_s7 = scalar_lea.vmem [#allocation5], %s981_s5 }
  0x31   : > { %p1401_p12 = pnand %p987_p9, %p207_p11  ;;  %s199_s9 = sshll.u32 %s192_s7, 4  ;;  %s1414_s9 = int_to_ptr.vmem [resolvable:$true] %s199_s9 }
  0x32   : > { %s189_s8 = scalar_lea.sflag [#allocation6], %s1347_s29  ;;  %s1152_s10 = scalar_lea.hbm %s1410_s6, 256 }
  0x33   : > { %p1153_p3 = scmp.ne.s32.totalorder %s1410_s6, %s1152_s10  ;;  %s1157_s30 = scalar_lea.hbm %s1787_s1, 512 }
  0x34   : > { %p1158_p0 = scmp.lt.u32.totalorder %s1410_s6, %s1787_s1  ;;  %p1159_p2 = scmp.lt.u32.totalorder %s1157_s30, %s1152_s10 }
  0x35   : > { %p1155_p8 = pnand %p1153_p3, %p1124_p1  ;;  %p1161_p5 = scmp.lt.u32.totalorder %s1152_s10, %s1410_s6 }
  0x36   : > { %p1160_p4 = por %p1159_p2, %p1158_p0 }
  0x37   : > { %p1156_p10 = pneg %p1155_p8 }
  0x38   : > { %p1162_p7 = por %p1161_p5, %p1160_p4 }
  0x3a   : > { %p1163_p9 = pnand %p1162_p7, %p1156_p10 }
  0x3c   : > { %1166 = shalt.err (!%p1163_p9)
}
  0x3d   : > { %s1167_s5 = scalar_lea.vmem %s1414_s9, 256  ;;  %s1257_s7 = smov [#allocation5]  }
  0x3e   : > { %p1168_p11 = scmp.ne.s32.totalorder %s1414_s9, %s1167_s5  ;;  %s1172_s12 = sshll.u32 %s1257_s7, 4  ;;  %s1173_s12 = int_to_ptr.vmem [resolvable:$false] %s1172_s12 }
  0x3f   : > { %s1174_s14 = scalar_lea.vmem %s1173_s12, 512  ;;  %p1175_p6 = scmp.lt.s32.totalorder %s1414_s9, %s1173_s12 }
  0x40   : > { %p1170_p3 = pnand %p1168_p11, %p1124_p1  ;;  %p1176_p0 = scmp.lt.s32.totalorder %s1174_s14, %s1167_s5 }
  0x42   : > { %p1171_p8 = pneg %p1170_p3  ;;  %p1177_p2 = por %p1176_p0, %p1175_p6 }
  0x44   : > { %p1178_p4 = pnand %p1177_p2, %p1171_p8 }
  0x46   : > { %1181 = shalt.err (!%p1178_p4)
}
  0x47   : > { %1048 = dma.hbm_to_vmem [thread:$0]  (!%p1362_p13), %s1410_s6, 256, %s1414_s9, %s189_s8, %s1255_s13, %s1255_s13, %s1256_s20  }
  0x48   : > { %211 = sbr.rel (%p1401_p12) target bundleno = 1253 (0x4e5), region = 36  ;;  %s1448_s10 = sand.u32 (!%p1401_p12), 1, %s1244_s16  }
  0x49   : > { %s988_s30 = sshll.u32 (!%p1401_p12), %s1448_s10, 4  ;;  %s214_s23 = scalar_lea.sflag (!%p1401_p12), [#allocation3], %s1448_s10 }
  0x4a   : > { %s217_s11 = scalar_lea.vmem (!%p1401_p12), [#allocation2], %s988_s30  ;;  %p1799_p6 = scmp.ne.s32.totalorder (!%p1401_p12), %s1794_s26, 0 }
  0x4f   : > { %1227 = dma.done.wait (%p1799_p6), %s214_s23, 256  }
  0x50   : > { %1229 = vsyncadd (%p1799_p6), %s214_s23, 4294967040  ;;  %s223_s29 = scalar_lea.sflag [#allocation6], %s1448_s10  ;;  %s226_s13 = scalar_lea.vmem [#allocation5], %s988_s30 }
  0x51   : > { %1231 = dma.done.wait (%p1799_p6), %s223_s29, 256  }
  0x52   : > { %1233 = vsyncadd (%p1799_p6), %s223_s29, 4294967040  ;;  %v1461_v0 = vld [vmem:[%s226_s13] sm:$0xff]  ;;  %v1463_v1 = vld [vmem:[%s226_s13 + $0x8] sm:$0xff]  ;;  %s1258_s6 = smov 16   ;;  %vm265_vm0 = vcmask 130048   ;;  %v569_v11 = vlaneseq  ;;  %s1259_s5 = smov 112  }
  0x53   : > { %v279_v2 = vpack.c.bf16 %v1463_v1, %v1461_v0  ;;  %v1103_v3 = vld [vmem:[%s1788_s2] sm:$0xff]   ;;  %v1474_v5 = vld [vmem:[%s217_s11 + $0x8] sm:$0xff]  ;;  %v705_v33 = vrot.slane %v1461_v0, 7  ;;  %v706_v37 = vrot.slane %v1463_v1, 7  ;;  %v1534_v39 = vmul.f32 2.0, %v1461_v0  ;;  %s1260_s7 = smov 113  }
  0x54   : > { %1016 = vmatprep.mubr.msk.bf16.mxu0 %vm265_vm0, %v1103_v3  ;;  %v1472_v4 = vld [vmem:[%s217_s11] sm:$0xff]  ;;  %v1104_v9 = vld [vmem:[%s1788_s2 + $0x8] sm:$0xff]   ;;  %v1489_v13 = vshrl.u32 %v569_v11, 7  ;;  %v605_v18 = vrot.slane %v1474_v5, 7  ;;  %v616_v29 = vrot.slane %v1474_v5, 1  ;;  %v1520_v31 = vmul.f32 2.0, %v1474_v5 }
  0x55   : > { %281 = vrot.lane.b32.xlu0 %v279_v2, %s1258_s6  ;;  %v278_v6 = vpack.c.bf16 %v1474_v5, %v1472_v4  ;;  %v1105_v10 = vld [vmem:[%s1789_s3] sm:$0xff]   ;;  %v604_v17 = vrot.slane %v1472_v4, 7  ;;  %v1511_v27 = vmul.f32 2.0, %v1472_v4  ;;  %v615_v28 = vrot.slane %v1472_v4, 1  ;;  %s1261_s12 = smov 127   ;;  %s990_s14 = sshll.u32 %s1448_s10, 3 }
  0x56   : > { %1020 = vmatprep.subr.bf16.mxu1 %v1105_v10  ;;  %v576_v16 = vand.u32 15, %v1489_v13  ;;  %vm606_vm1 = vcmp.lt.s32.totalorder %v1489_v13, 1  ;;  %vm617_vm3 = vcmp.lt.s32.totalorder %v1489_v13, 7  ;;  %v571_v30 = vadd.s32 8, %v1489_v13  ;;  %s1001_s29 = sshll.u32 %s1309_s19, 7  ;;  %s255_s20 = scalar_lea.vmem [#allocation7], %s990_s14 }
  0x57   : > { %1021 = vmatpush3.bf16.msra.mxu1 %v1105_v10  ;;  %v608_v25 = vsel %vm606_vm1, %v605_v18, %v604_v17  ;;  %v607_v32 = vsel %vm606_vm1, %v604_v17, %v605_v18  ;;  %v619_v36 = vsel %vm617_vm3, %v616_v29, %v615_v28  ;;  %v618_v38 = vsel %vm617_vm3, %v615_v28, %v616_v29  ;;  %s885_s22 = sshll.u32 %s255_s20, 4  ;;  %p1804_p1 = scmp.ne.s32.totalorder %s1795_s27, 0  ;;  %s1744_s22 = int_to_ptr.vmem [resolvable:$true] %s885_s22 }
  0x58   : > { %vm1501_vm2 = vcmp.ne.s32.totalorder %v576_v16, 0  ;;  %v583_v35 = vand.u32 15, %v571_v30  ;;  %v715_v40 = vrot.slane %v1461_v0, 1  ;;  %v716_v41 = vrot.slane %v1463_v1, 1  ;;  %s1182_s19 = scalar_lea.vmem %s1744_s22, 128 }
  0x59   : > { %v609_v26 = vsel %vm1501_vm2, %v608_v25, 0.0  ;;  %v614_v43 = vadd.f32 %v1520_v31, %v607_v32  ;;  %v708_v44 = vsel %vm606_vm1, %v706_v37, %v705_v33  ;;  %v1548_v45 = vmul.f32 2.0, %v1463_v1  ;;  %p1183_p13 = scmp.ne.s32.totalorder %s1744_s22, %s1182_s19 }
  0x5a   : > { %v613_v34 = vadd.f32 %v1511_v27, %v609_v26  ;;  %vm1540_vm4 = vcmp.ne.s32.totalorder %v583_v35, 15  ;;  %v709_v47 = vsel %vm1501_vm2, %v708_v44, 0.0  ;;  %v707_v48 = vsel %vm606_vm1, %v705_v33, %v706_v37 }
  0x5b   : > { %v621_v46 = vsel %vm1540_vm4, %v619_v36, 0.0  ;;  %v718_v49 = vsel %vm617_vm3, %v716_v41, %v715_v40  ;;  %v713_v51 = vadd.f32 %v1534_v39, %v709_v47  ;;  %v717_v53 = vsel %vm617_vm3, %v715_v40, %v716_v41  ;;  %p1184_p12 = pnand %p1183_p13, %p1804_p1 }
  0x5c   : > { %v1560_v50 = vadd.f32 %v618_v38, %v613_v34  ;;  %v1565_v52 = vadd.f32 %v621_v46, %v614_v43  ;;  %v714_v54 = vadd.f32 %v1548_v45, %v707_v48  ;;  %v720_v55 = vsel %vm1540_vm4, %v718_v49, 0.0 }
  0x5d   : > { %v1574_v56 = vadd.f32 %v717_v53, %v713_v51  ;;  %vm624_vm5 = vcmask 1047680   ;;  %p1185_p10 = pneg %p1184_p12 }
  0x5e   : > { %v1578_v57 = vadd.f32 %v720_v55, %v714_v54 }
  0xc7   : > { %v282_v7 = vpop.permute.xlu0 %281 }
  0xc8   : > { %v285_v8 = vsel %vm265_vm0, %v278_v6, %v282_v7 }
  0xc9   : > { %1014 = vmatprep.subr.bf16.mxu0 %v285_v8 }
  0xca   : > { %1015 = vmatpush3.bf16.msra.mxu0 %v285_v8 }
  0xcd   : > { %1017 = vmatmul.mubr.msk.bf16.vlgmr.msra.gmra.mrb[0].mxu0 %vm265_vm0, %v1104_v9 }
 0x1a0   : > { %v1486_v12 = vpop.f32.mrb[0].mxu0 }
 0x1a1   : > { %v341_v14 = vpop.f32.mrb[1].mxu0 }
 0x1a2   : > { %v1491_v15 = vpop.f32.mrb[2].mxu0 }
 0x1a3   : > { %v374_v19 = vpack.c.bf16 %v1491_v15, %v1486_v12  ;;  %v344_v20 = vpop.f32.mrb[3].mxu0  ;;  %v1098_v21 = vpack.i.bf16 %v1491_v15, %v1486_v12 }
 0x1a4   : > { %v1093_v22 = vpack.i.bf16 %v344_v20, %v341_v14  ;;  %v372_v23 = vpack.c.bf16 %v344_v20, %v341_v14 }
 0x1a5   : > { %1099 = vrot.lane.b32.xlu1 %v1098_v21, %s1259_s5 }
 0x1a6   : > { %1094 = vrot.lane.b32.xlu0 %v1093_v22, %s1259_s5  ;;  %1022 = vmatprep.mubr.msk.bf16.mxu1 %vm265_vm0, %v372_v23 }
 0x1a9   : > { %657 = vrot.lane.b32.xlu1 %v1472_v4, %s1258_s6 }
 0x1aa   : > { %660 = vrot.lane.b32.xlu0 %v1474_v5, %s1258_s6 }
 0x1ad   : > { %755 = vrot.lane.b32.xlu1 %v1461_v0, %s1258_s6 }
 0x1ae   : > { %758 = vrot.lane.b32.xlu0 %v1463_v1, %s1258_s6 }
 0x1b1   : > { %625 = vrot.lane.b32.xlu1 %v1560_v50, %s1258_s6 }
 0x1b2   : > { %628 = vrot.lane.b32.xlu0 %v1565_v52, %s1258_s6 }
 0x1b5   : > { %723 = vrot.lane.b32.xlu1 %v1574_v56, %s1258_s6 }
 0x1b6   : > { %726 = vrot.lane.b32.xlu0 %v1578_v57, %s1258_s6 }
 0x217   : > { %v1100_v58 = vpop.permute.xlu1 %1099 }
 0x218   : > { %v1095_v59 = vpop.permute.xlu0 %1094  ;;  %v1102_v7 = vunpack.i.h.bf16 %v1100_v58  ;;  %v1101_v8 = vunpack.i.l.bf16 %v1100_v58 }
 0x219   : > { %v1097_v60 = vunpack.i.h.bf16 %v1095_v59  ;;  %v1096_v61 = vunpack.i.l.bf16 %v1095_v59 }
 0x21a   : > { %v375_v17 = vpack.c.bf16 %v1102_v7, %v1101_v8  ;;  %v262_v7 = vsub.f32 %v1474_v5, %v1463_v1 }
 0x21b   : > { %v373_v62 = vpack.c.bf16 %v1097_v60, %v1096_v61  ;;  %v658_v63 = vpop.permute.xlu1 %657 }
 0x21c   : > { %v659_v2 = vsel %vm624_vm5, %v658_v63, %v1472_v4  ;;  %v661_v3 = vpop.permute.xlu0 %660 }
 0x21d   : > { %1023 = vmatmul.mubr.msk.bf16.vlgmr.msra.gmra.mrb[0].mxu1 %vm265_vm0, %v373_v62  ;;  %663 = vrot.lane.b32.xlu1 %v659_v2, %s1258_s6  ;;  %v662_v6 = vsel %vm624_vm5, %v661_v3, %v1474_v5 }
 0x21e   : > { %1026 = vmatprep.mubr.msk.bf16.mxu1 %vm265_vm0, %v374_v19  ;;  %665 = vrot.lane.b32.xlu0 %v662_v6, %s1258_s6  ;;  %v261_v6 = vsub.f32 %v1472_v4, %v1461_v0 }
 0x21f   : > { %v756_v9 = vpop.permute.xlu1 %755 }
 0x220   : > { %v757_v10 = vsel %vm624_vm5, %v756_v9, %v1461_v0  ;;  %v759_v14 = vpop.permute.xlu0 %758  ;;  %v263_v8 = vmul.f32 %v261_v6, %v261_v6  ;;  %v264_v9 = vmul.f32 %v262_v7, %v262_v7 }
 0x221   : > { %761 = vrot.lane.b32.xlu1 %v757_v10, %s1258_s6  ;;  %v760_v16 = vsel %vm624_vm5, %v759_v14, %v1463_v1 }
 0x222   : > { %763 = vrot.lane.b32.xlu0 %v760_v16, %s1258_s6  ;;  %v266_v10 = vsel %vm265_vm0, %v263_v8, 0.0  ;;  %v267_v14 = vsel %vm265_vm0, %v264_v9, 0.0 }
 0x223   : > { %v626_v12 = vpop.permute.xlu1 %625  ;;  %v268_v16 = vadd.f32 %v267_v14, %v266_v10 }
 0x224   : > { %v627_v15 = vsel %vm624_vm5, %v626_v12, %v1560_v50  ;;  %v629_v18 = vpop.permute.xlu0 %628 }
 0x225   : > { %1027 = vmatmul.mubr.msk.bf16.gmra.mrb[4].mxu1 %vm265_vm0, %v375_v17  ;;  %631 = vrot.lane.b32.xlu1 %v627_v15, %s1258_s6  ;;  %v630_v19 = vsel %vm624_vm5, %v629_v18, %v1565_v52 }
 0x226   : > { %633 = vrot.lane.b32.xlu0 %v630_v19, %s1258_s6 }
 0x227   : > { %v724_v20 = vpop.permute.xlu1 %723 }
 0x228   : > { %v725_v21 = vsel %vm624_vm5, %v724_v20, %v1574_v56  ;;  %v727_v22 = vpop.permute.xlu0 %726 }
 0x229   : > { %729 = vrot.lane.b32.xlu1 %v725_v21, %s1258_s6  ;;  %v728_v23 = vsel %vm624_vm5, %v727_v22, %v1578_v57  ;;  %v597_v21 = vand.u32 127, %v569_v11 }
 0x22a   : > { %731 = vrot.lane.b32.xlu0 %v728_v23, %s1258_s6 }
 0x22b   : > { %vm602_vm6 = vcmp.ne.s32.totalorder %v597_v21, 0  ;;  %vm603_vm7 = vcmp.ne.s32.totalorder %v597_v21, 15 }
 0x28f   : > { %v664_v34 = vpop.permute.xlu1 %663 }
 0x290   : > { %v666_v36 = vpop.permute.xlu0 %665  ;;  %v667_v37 = vsel %vm624_vm5, %v664_v34, %v1472_v4 }
 0x291   : > { %v668_v40 = vsel %vm624_vm5, %v666_v36, %v1474_v5 }
 0x293   : > { %v762_v38 = vpop.permute.xlu1 %761 }
 0x294   : > { %v764_v41 = vpop.permute.xlu0 %763  ;;  %v765_v43 = vsel %vm624_vm5, %v762_v38, %v1461_v0 }
 0x295   : > { %v766_v44 = vsel %vm624_vm5, %v764_v41, %v1463_v1 }
 0x297   : > { %v632_v46 = vpop.permute.xlu1 %631 }
 0x298   : > { %v634_v47 = vpop.permute.xlu0 %633  ;;  %v635_v48 = vsel %vm624_vm5, %v632_v46, %v1560_v50 }
 0x299   : > { %v636_v49 = vsel %vm624_vm5, %v634_v47, %v1565_v52 }
 0x29b   : > { %v730_v51 = vpop.permute.xlu1 %729 }
 0x29c   : > { %v732_v53 = vpop.permute.xlu0 %731  ;;  %v733_v54 = vsel %vm624_vm5, %v730_v51, %v1574_v56 }
 0x29d   : > { %v734_v55 = vsel %vm624_vm5, %v732_v53, %v1578_v57 }
 0x2f0   : > { %v1614_v25 = vpop.f32.mrb[0].mxu1 }
 0x2f1   : > { %v1616_v26 = vpop.f32.mrb[1].mxu1 }
 0x2f2   : > { %v1618_v28 = vpop.f32.mrb[2].mxu1 }
 0x2f3   : > { %v1620_v29 = vpop.f32.mrb[3].mxu1 }
 0x2f8   : > { %v1028_v30 = vpop.f32.mrb[4].mxu1 }
 0x2f9   : > { %v446_v32 = vpop.f32.mrb[5].mxu1 }
 0x2fa   : > { %481 = vrot.lane.b32.xlu1 %v446_v32, %s1258_s6  ;;  %v1029_v33 = vpop.f32.mrb[6].mxu1 }
 0x2fb   : > { %v449_v35 = vpop.f32.mrb[7].mxu1 }
 0x2fc   : > { %483 = vrot.lane.b32.xlu0 %v449_v35, %s1258_s6 }
 0x2fe   : > { %485 = vrot.lane.b32.xlu1 %v1028_v30, %s1258_s6 }
 0x300   : > { %487 = vrot.lane.b32.xlu0 %v1029_v33, %s1258_s6 }
 0x302   : > { %671 = vrot.lane.b32.xlu1 %v667_v37, %s1260_s7 }
 0x304   : > { %673 = vrot.lane.b32.xlu0 %v668_v40, %s1260_s7 }
 0x306   : > { %769 = vrot.lane.b32.xlu1 %v765_v43, %s1260_s7 }
 0x308   : > { %771 = vrot.lane.b32.xlu0 %v766_v44, %s1260_s7 }
 0x30a   : > { %681 = vrot.lane.b32.xlu1 %v667_v37, %s1261_s12 }
 0x30c   : > { %683 = vrot.lane.b32.xlu0 %v668_v40, %s1261_s12 }
 0x30e   : > { %779 = vrot.lane.b32.xlu1 %v765_v43, %s1261_s12 }
 0x310   : > { %781 = vrot.lane.b32.xlu0 %v766_v44, %s1261_s12 }
 0x312   : > { %639 = vrot.lane.b32.xlu1 %v635_v48, %s1261_s12 }
 0x314   : > { %641 = vrot.lane.b32.xlu0 %v636_v49, %s1261_s12 }
 0x316   : > { %647 = vrot.lane.b32.xlu1 %v635_v48, %s1260_s7 }
 0x318   : > { %649 = vrot.lane.b32.xlu0 %v636_v49, %s1260_s7 }
 0x31a   : > { %737 = vrot.lane.b32.xlu1 %v733_v54, %s1261_s12 }
 0x31c   : > { %739 = vrot.lane.b32.xlu0 %v734_v55, %s1261_s12  ;;  %s1262_s12 = smov [#allocation7]  }
 0x31d   : > { %s1186_s14 = sshll.u32 %s1262_s12, 4  ;;  %s1187_s14 = int_to_ptr.vmem [resolvable:$false] %s1186_s14 }
 0x31e   : > { %745 = vrot.lane.b32.xlu1 %v733_v54, %s1260_s7  ;;  %p1189_p5 = scmp.lt.s32.totalorder %s1744_s22, %s1187_s14 }
 0x320   : > { %747 = vrot.lane.b32.xlu0 %v734_v55, %s1260_s7  ;;  %s872_s7 = scalar_lea.sflag [#allocation4], %s1448_s10 }
 0x322   : > { %465 = vrot.lane.b32.xlu1 %v446_v32, %s1259_s5 }
 0x324   : > { %471 = vrot.lane.b32.xlu0 %v1029_v33, %s1259_s5 }
 0x326   : > { %469 = vrot.lane.b32.xlu1 %v1028_v30, %s1259_s5 }
 0x328   : > { %467 = vrot.lane.b32.xlu0 %v449_v35, %s1259_s5 }
 0x36c   : > { %v482_v50 = vpop.permute.xlu1 %481 }
 0x36d   : > { %v493_v52 = vadd.f32 %v482_v50, %v1616_v26 }
 0x36e   : > { %v484_v56 = vpop.permute.xlu0 %483 }
 0x36f   : > { %v501_v58 = vmul.f32 %v493_v52, %v493_v52  ;;  %v494_v59 = vadd.f32 %v484_v56, %v1620_v29 }
 0x370   : > { %v486_v57 = vpop.permute.xlu1 %485 }
 0x371   : > { %v502_v60 = vmul.f32 %v494_v59, %v494_v59  ;;  %v495_v61 = vadd.f32 %v1614_v25, %v486_v57  ;;  %509 = vrot.lane.b32.xlu1 %v501_v58, %s1259_s5 }
 0x372   : > { %v488_v62 = vpop.permute.xlu0 %487 }
 0x373   : > { %v503_v63 = vmul.f32 %v495_v61, %v495_v61  ;;  %v496_v2 = vadd.f32 %v1618_v28, %v488_v62  ;;  %511 = vrot.lane.b32.xlu0 %v502_v60, %s1259_s5 }
 0x374   : > { %v672_v17 = vpop.permute.xlu1 %671 }
 0x375   : > { %v504_v3 = vmul.f32 %v496_v2, %v496_v2  ;;  %513 = vrot.lane.b32.xlu1 %v503_v63, %s1259_s5  ;;  %v677_v1 = vsel %vm602_vm6, %v672_v17, 0.0 }
 0x376   : > { %v674_v12 = vpop.permute.xlu0 %673  ;;  %v679_v33 = vadd.f32 %v677_v1, %v1511_v27 }
 0x377   : > { %515 = vrot.lane.b32.xlu0 %v504_v3, %s1259_s5  ;;  %v678_v5 = vsel %vm602_vm6, %v674_v12, 0.0  ;;  %s1742_s5 = scalar_lea.hbm %s1790_s4, %s1001_s29 }
 0x378   : > { %v770_v15 = vpop.permute.xlu1 %769  ;;  %v680_v34 = vadd.f32 %v678_v5, %v1520_v31 }
 0x379   : > { %v775_v23 = vsel %vm602_vm6, %v770_v15, 0.0 }
 0x37a   : > { %v772_v18 = vpop.permute.xlu0 %771  ;;  %v777_v36 = vadd.f32 %v775_v23, %v1534_v39 }
 0x37b   : > { %v776_v30 = vsel %vm602_vm6, %v772_v18, 0.0 }
 0x37c   : > { %v682_v19 = vpop.permute.xlu1 %681  ;;  %v778_v37 = vadd.f32 %v776_v30, %v1548_v45 }
 0x37d   : > { %v687_v11 = vsel %vm603_vm7, %v682_v19, 0.0 }
 0x37e   : > { %v684_v20 = vpop.permute.xlu0 %683  ;;  %v689_v41 = vadd.f32 %v687_v11, %v679_v33 }
 0x37f   : > { %v688_v35 = vsel %vm603_vm7, %v684_v20, 0.0 }
 0x380   : > { %v780_v0 = vpop.permute.xlu1 %779  ;;  %v690_v43 = vadd.f32 %v688_v35, %v680_v34  ;;  %v691_v48 = vrot.slane %v689_v41, 1  ;;  %v697_v31 = vrot.slane %v689_v41, 7 }
 0x381   : > { %v785_v38 = vsel %vm603_vm7, %v780_v0, 0.0 }
 0x382   : > { %v782_v4 = vpop.permute.xlu0 %781  ;;  %v787_v47 = vadd.f32 %v785_v38, %v777_v36  ;;  %v692_v49 = vrot.slane %v690_v43, 1  ;;  %v698_v51 = vrot.slane %v690_v43, 7 }
 0x383   : > { %v786_v40 = vsel %vm603_vm7, %v782_v4, 0.0 }
 0x384   : > { %v640_v22 = vpop.permute.xlu1 %639  ;;  %v788_v27 = vadd.f32 %v786_v40, %v778_v37  ;;  %v795_v53 = vrot.slane %v787_v47, 7  ;;  %v789_v39 = vrot.slane %v787_v47, 1  ;;  %v694_v52 = vsel %vm617_vm3, %v692_v49, %v691_v48 }
 0x385   : > { %v700_v56 = vsel %vm606_vm1, %v698_v51, %v697_v31  ;;  %v693_v58 = vsel %vm617_vm3, %v691_v48, %v692_v49  ;;  %v696_v57 = vsel %vm1540_vm4, %v694_v52, 0.0  ;;  %v699_v60 = vsel %vm606_vm1, %v697_v31, %v698_v51 }
 0x386   : > { %v642_v32 = vpop.permute.xlu0 %641  ;;  %v796_v54 = vrot.slane %v788_v27, 7  ;;  %v790_v50 = vrot.slane %v788_v27, 1  ;;  %v701_v61 = vsel %vm1501_vm2, %v700_v56, 0.0  ;;  %v645_v2 = vsel %vm603_vm7, %v640_v22, 0.0 }
 0x387   : > { %v646_v3 = vsel %vm603_vm7, %v642_v32, 0.0  ;;  %v703_v19 = vsub.f32 %v693_v58, %v701_v61  ;;  %v704_v24 = vsub.f32 %v696_v57, %v699_v60 }
 0x388   : > { %v648_v44 = vpop.permute.xlu1 %647  ;;  %v798_v59 = vsel %vm606_vm1, %v796_v54, %v795_v53  ;;  %v792_v62 = vsel %vm617_vm3, %v790_v50, %v789_v39  ;;  %v791_v63 = vsel %vm617_vm3, %v789_v39, %v790_v50  ;;  %v797_v8 = vsel %vm606_vm1, %v795_v53, %v796_v54 }
 0x389   : > { %v653_v6 = vsel %vm602_vm6, %v648_v44, 0.0  ;;  %v799_v9 = vsel %vm1501_vm2, %v798_v59, 0.0  ;;  %v794_v17 = vsel %vm1540_vm4, %v792_v62, 0.0  ;;  %v805_v23 = vmul.f32 %v703_v19, %v703_v19 }
 0x38a   : > { %v650_v46 = vpop.permute.xlu0 %649  ;;  %v801_v13 = vsub.f32 %v791_v63, %v799_v9  ;;  %v655_v20 = vsub.f32 %v645_v2, %v653_v6  ;;  %v802_v4 = vsub.f32 %v794_v17, %v797_v8  ;;  %v806_v42 = vmul.f32 %v704_v24, %v704_v24 }
 0x38b   : > { %v654_v12 = vsel %vm602_vm6, %v650_v46, 0.0 }
 0x38c   : > { %v738_v55 = vpop.permute.xlu1 %737  ;;  %v656_v1 = vsub.f32 %v646_v3, %v654_v12  ;;  %v803_v22 = vmul.f32 %v655_v20, %v655_v20  ;;  %v811_v32 = vmul.f32 %v801_v13, %v801_v13  ;;  %v812_v34 = vmul.f32 %v802_v4, %v802_v4 }
 0x38d   : > { %v743_v10 = vsel %vm603_vm7, %v738_v55, 0.0  ;;  %v817_v52 = vmul.f32 %v801_v13, %v703_v19  ;;  %v818_v56 = vmul.f32 %v802_v4, %v704_v24 }
 0x38e   : > { %v740_v45 = vpop.permute.xlu0 %739  ;;  %v804_v33 = vmul.f32 %v656_v1, %v656_v1  ;;  %v807_v35 = vadd.f32 %v805_v23, %v803_v22 }
 0x38f   : > { %v744_v15 = vsel %vm603_vm7, %v740_v45, 0.0 }
 0x390   : > { %v746_v7 = vpop.permute.xlu1 %745  ;;  %v808_v21 = vadd.f32 %v806_v42, %v804_v33 }
 0x391   : > { %v751_v14 = vsel %vm602_vm6, %v746_v7, 0.0 }
 0x392   : > { %v753_v0 = vsub.f32 %v743_v10, %v751_v14 }
 0x394   : > { %v809_v30 = vmul.f32 %v753_v0, %v753_v0  ;;  %v466_v43 = vpop.permute.xlu1 %465 }
 0x395   : > { %v477_v48 = vsub.f32 %v1616_v26, %v466_v43  ;;  %v815_v26 = vmul.f32 %v753_v0, %v655_v20 }
 0x396   : > { %v813_v36 = vadd.f32 %v811_v32, %v809_v30 }
 0x397   : > { %v497_v53 = vmul.f32 %v477_v48, %v477_v48  ;;  %v819_v63 = vadd.f32 %v817_v52, %v815_v26 }
 0x398   : > { %v821_v38 = vmul.f32 %v813_v36, %v807_v35  ;;  %v1707_v27 = vmin.f32 %v807_v35, %v813_v36  ;;  %v470_v49 = vpop.permute.xlu1 %469 }
 0x399   : > { %269 = vadd.xlane.f32.xlu1 %v268_v16  ;;  %v748_v16 = vpop.permute.xlu0 %747  ;;  %v479_v54 = vsub.f32 %v1614_v25, %v470_v49 }
 0x39a   : > { %v752_v18 = vsel %vm602_vm6, %v748_v16, 0.0  ;;  %vm839_vm8 = vcmp.gt.f32.partialorder %v821_v38, 0.0  ;;  %vm827_vm10 = vcmp.eq.f32.partialorder %v1707_v27, inf  ;;  %vm829_vm12 = vcmp.eq.f32.partialorder %v1707_v27, 0.0 }
 0x39b   : > { %v754_v5 = vsub.f32 %v744_v15, %v752_v18  ;;  %v841_v44 = vsel %vm839_vm8, %v821_v38, 1.0  ;;  %v499_v57 = vmul.f32 %v479_v54, %v479_v54  ;;  %v830_v13 = vand.u32 2147483648, %v1707_v27 }
 0x39c   : > { %1106 = vrsqrt.f32 %v841_v44 }
 0x39d   : > { %v810_v11 = vmul.f32 %v754_v5, %v754_v5  ;;  %v472_v41 = vpop.permute.xlu0 %471  ;;  %v816_v58 = vmul.f32 %v754_v5, %v656_v1 }
 0x39e   : > { %v480_v39 = vsub.f32 %v1618_v28, %v472_v41 }
 0x39f   : > { %v814_v37 = vadd.f32 %v812_v34, %v810_v11  ;;  %v820_v2 = vadd.f32 %v818_v56, %v816_v58 }
 0x3a0   : > { %v500_v61 = vmul.f32 %v480_v39, %v480_v39 }
 0x3a1   : > { %v822_v40 = vmul.f32 %v814_v37, %v808_v21  ;;  %v468_v47 = vpop.permute.xlu0 %467  ;;  %v1710_v31 = vmin.f32 %v808_v21, %v814_v37 }
 0x3a2   : > { %v478_v51 = vsub.f32 %v1620_v29, %v468_v47 }
 0x3a3   : > { %vm840_vm9 = vcmp.gt.f32.partialorder %v822_v40, 0.0  ;;  %vm834_vm11 = vcmp.eq.f32.partialorder %v1710_v31, inf  ;;  %vm836_vm13 = vcmp.eq.f32.partialorder %v1710_v31, 0.0  ;;  %v837_v24 = vand.u32 2147483648, %v1710_v31 }
 0x3a4   : > { %v842_v46 = vsel %vm840_vm9, %v822_v40, 1.0  ;;  %v498_v50 = vmul.f32 %v478_v51, %v478_v51 }
 0x3a5   : > { %1108 = vrsqrt.f32 %v842_v46 }
 0x3a6   : > { %1110 = vrsqrt.f32 %v1707_v27  ;;  %v1107_v62 = vpop.eup %1106 }
 0x3a7   : > { %1112 = vrsqrt.f32 %v1710_v31  ;;  %v845_v9 = vmul.f32 %v1107_v62, %v819_v63 }
 0x3a9   : > { %v847_v15 = vsel %vm839_vm8, %v845_v9, 1.0 }
 0x3aa   : > { %v849_v5 = vsub.f32 1.0, %v847_v15 }
 0x3af   : > { %v1109_v6 = vpop.eup %1108 }
 0x3b0   : > { %v1111_v7 = vpop.eup %1110  ;;  %v846_v10 = vmul.f32 %v1109_v6, %v820_v2 }
 0x3b1   : > { %v1113_v8 = vpop.eup %1112  ;;  %v826_v14 = vmul.f32 %v1111_v7, %v1707_v27 }
 0x3b2   : > { %v833_v17 = vmul.f32 %v1113_v8, %v1710_v31  ;;  %v848_v18 = vsel %vm840_vm9, %v846_v10, 1.0 }
 0x3b3   : > { %v828_v0 = vsel %vm827_vm10, %v1707_v27, %v826_v14  ;;  %v850_v22 = vsub.f32 1.0, %v848_v18 }
 0x3b4   : > { %v835_v1 = vsel %vm834_vm11, %v1710_v31, %v833_v17  ;;  %v831_v46 = vsel %vm829_vm12, %v830_v13, %v828_v0 }
 0x3b5   : > { %v838_v47 = vsel %vm836_vm13, %v837_v24, %v835_v1 }
 0x3b6   : > { %v852_v54 = vmul.f32 %v850_v22, %v838_v47 }
 0x3b8   : > { %v854_v26 = vsel %vm265_vm0, %v852_v54, 0.0 }
 0x3e3   : > { %v510_v55 = vpop.permute.xlu1 %509 }
 0x3e4   : > { %v521_v45 = vadd.f32 %v510_v55, %v497_v53  ;;  %v851_v53 = vmul.f32 %v849_v5, %v831_v46 }
 0x3e5   : > { %v512_v59 = vpop.permute.xlu0 %511 }
 0x3e6   : > { %1114 = vrsqrt.f32 %v521_v45  ;;  %v522_v29 = vadd.f32 %v512_v59, %v498_v50  ;;  %vm527_vm14 = vcmp.eq.f32.partialorder %v521_v45, inf  ;;  %vm529_vm15 = vcmp.eq.f32.partialorder %v521_v45, 0.0 }
 0x3e7   : > { %v514_v60 = vpop.permute.xlu1 %513  ;;  %v530_v30 = vand.u32 2147483648, %v521_v45 }
 0x3e8   : > { %1116 = vrsqrt.f32 %v522_v29  ;;  %v523_v25 = vadd.f32 %v514_v60, %v499_v57  ;;  %vm534_vm1 = vcmp.eq.f32.partialorder %v522_v29, inf  ;;  %v537_v33 = vand.u32 2147483648, %v522_v29 }
 0x3e9   : > { %v516_v3 = vpop.permute.xlu0 %515  ;;  %vm536_vm5 = vcmp.eq.f32.partialorder %v522_v29, 0.0 }
 0x3ea   : > { %1118 = vrsqrt.f32 %v523_v25  ;;  %v524_v28 = vadd.f32 %v516_v3, %v500_v61  ;;  %vm541_vm2 = vcmp.eq.f32.partialorder %v523_v25, inf  ;;  %v544_v34 = vand.u32 2147483648, %v523_v25 }
 0x3eb   : > { %vm543_vm3 = vcmp.eq.f32.partialorder %v523_v25, 0.0 }
 0x3ec   : > { %1120 = vrsqrt.f32 %v524_v28  ;;  %vm548_vm4 = vcmp.eq.f32.partialorder %v524_v28, inf  ;;  %v551_v38 = vand.u32 2147483648, %v524_v28  ;;  %vm550_vm6 = vcmp.eq.f32.partialorder %v524_v28, 0.0 }
 0x3f0   : > { %v1115_v16 = vpop.eup %1114 }
 0x3f1   : > { %v526_v12 = vmul.f32 %v1115_v16, %v521_v45 }
 0x3f2   : > { %v1117_v19 = vpop.eup %1116 }
 0x3f3   : > { %v533_v20 = vmul.f32 %v1117_v19, %v522_v29  ;;  %v528_v23 = vsel %vm527_vm14, %v521_v45, %v526_v12  ;;  %v853_v45 = vsel %vm265_vm0, %v851_v53, 0.0 }
 0x3f4   : > { %v1119_v4 = vpop.eup %1118  ;;  %v531_v21 = vsel %vm529_vm15, %v530_v30, %v528_v23  ;;  %v855_v27 = vadd.f32 %v854_v26, %v853_v45 }
 0x3f5   : > { %v540_v32 = vmul.f32 %v1119_v4, %v523_v25  ;;  %v535_v11 = vsel %vm534_vm1, %v522_v29, %v533_v20 }
 0x3f6   : > { %v1121_v42 = vpop.eup %1120  ;;  %v538_v43 = vsel %vm536_vm5, %v537_v33, %v535_v11 }
 0x3f7   : > { %v542_v35 = vsel %vm541_vm2, %v523_v25, %v540_v32  ;;  %v547_v36 = vmul.f32 %v1121_v42, %v524_v28 }
 0x3f8   : > { %v545_v37 = vsel %vm543_vm3, %v544_v34, %v542_v35 }
 0x3f9   : > { %v549_v40 = vsel %vm548_vm4, %v524_v28, %v547_v36  ;;  %v553_v41 = vsub.f32 %v531_v21, %v545_v37 }
 0x3fa   : > { %v552_v44 = vsel %vm550_vm6, %v551_v38, %v549_v40 }
 0x3fb   : > { %v554_v48 = vsub.f32 %v538_v43, %v552_v44  ;;  %v555_v49 = vand.u32 2147483647, %v553_v41 }
 0x3fd   : > { %v556_v51 = vand.u32 2147483647, %v554_v48  ;;  %v557_v55 = vsel %vm265_vm0, %v555_v49, 0.0 }
 0x3ff   : > { %v558_v39 = vsel %vm265_vm0, %v556_v51, 0.0 }
 0x400   : > { %v559_v50 = vadd.f32 %v558_v39, %v557_v55 }
 0x402   : > { %560 = vadd.xlane.f32.xlu0 %v559_v50 }
 0x406   : > { %856 = vadd.xlane.f32.xlu0 %v855_v27 }
 0x426   : > { %v270_v52 = vpop.xlane.xlu1 %269 }
 0x427   : > { %v271_v31 = vrot.slane %v270_v52, 4 }
 0x429   : > { %v272_v56 = vadd.f32 %v271_v31, %v270_v52 }
 0x42b   : > { %v273_v58 = vrot.slane %v272_v56, 2 }
 0x42d   : > { %v274_v59 = vadd.f32 %v273_v58, %v272_v56 }
 0x42f   : > { %v275_v57 = vrot.slane %v274_v59, 1 }
 0x431   : > { %v276_v29 = vadd.f32 %v275_v57, %v274_v59 }
 0x433   : > { %1030 = vpush %v276_v29 }
 0x464   : > { %s1031_s30 = spop %1030 }
 0x48f   : > { %v561_v60 = vpop.xlane.xlu0 %560 }
 0x490   : > { %v562_v61 = vrot.slane %v561_v60, 4 }
 0x492   : > { %v563_v25 = vadd.f32 %v562_v61, %v561_v60 }
 0x493   : > { %v857_v62 = vpop.xlane.xlu0 %856 }
 0x494   : > { %v564_v63 = vrot.slane %v563_v25, 2  ;;  %v858_v2 = vrot.slane %v857_v62, 4 }
 0x496   : > { %v859_v3 = vadd.f32 %v858_v2, %v857_v62  ;;  %v565_v6 = vadd.f32 %v564_v63, %v563_v25 }
 0x498   : > { %v860_v28 = vrot.slane %v859_v3, 2  ;;  %v566_v7 = vrot.slane %v565_v6, 1 }
 0x49a   : > { %v861_v8 = vadd.f32 %v860_v28, %v859_v3  ;;  %v567_v9 = vadd.f32 %v566_v7, %v565_v6 }
 0x49c   : > { %1032 = vpush %v567_v9  ;;  %v862_v10 = vrot.slane %v861_v8, 1 }
 0x49e   : > { %v863_v14 = vadd.f32 %v862_v10, %v861_v8 }
 0x4a0   : > { %1034 = vpush %v863_v14 }
 0x4cd   : > { %s1033_s23 = spop %1032 }
 0x4ce   : > { %s865_s11 = smul.f32 0.05, %s1033_s23 }
 0x4d0   : > { %s866_s6 = sadd.f32 %s1031_s30, %s865_s11  ;;  %s1188_s30 = scalar_lea.vmem %s1187_s14, 256 }
 0x4d1   : > { %s1035_s13 = spop %1034  ;;  %p1190_p7 = scmp.lt.s32.totalorder %s1188_s30, %s1182_s19 }
 0x4d2   : > { %s867_s26 = smul.f32 0.05, %s1035_s13 }
 0x4d3   : > { %p1191_p9 = por %p1190_p7, %p1189_p5 }
 0x4d4   : > { %s868_s9 = sadd.f32 %s867_s26, %s866_s6 }
 0x4d5   : > { %p1192_p11 = pnand %p1191_p9, %p1185_p10 }
 0x4d6   : > { %v869_v16 = vstv %s868_s9 }
 0x4d7   : > { %870 = vst [vmem:[%s255_s20] sm:$0xff] %v869_v16 }
 0x4d8   : > { %1195 = shalt.err (!%p1192_p11)
}
 0x4d9   : > { %s1196_s10 = scalar_lea.hbm %s1742_s5, 128  ;;  %s1200_s29 = scalar_lea.hbm %s1790_s4, 256 }
 0x4da   : > { %p1197_p3 = scmp.ne.s32.totalorder %s1742_s5, %s1196_s10  ;;  %p1201_p2 = scmp.lt.u32.totalorder %s1742_s5, %s1790_s4 }
 0x4db   : > { %p1202_p4 = scmp.lt.u32.totalorder %s1200_s29, %s1196_s10  ;;  %p1204_p13 = scmp.lt.u32.totalorder %s1196_s10, %s1742_s5 }
 0x4dc   : > { %p1198_p8 = pnand %p1197_p3, %p1804_p1 }
 0x4dd   : > { %p1203_p6 = por %p1202_p4, %p1201_p2 }
 0x4de   : > { %p1199_p0 = pneg %p1198_p8 }
 0x4df   : > { %p1205_p12 = por %p1204_p13, %p1203_p6 }
 0x4e1   : > { %p1206_p10 = pnand %p1205_p12, %p1199_p0 }
 0x4e3   : > { %1209 = shalt.err (!%p1206_p10)
}
 0x4e4   : > { %1040 = dma.vmem_to_hbm [thread:$0]  (%p1804_p1), %s1744_s22, 128, %s1742_s5, %s872_s7  }
 0x4e5 PF: > { %s897_s6 = sand.u32 1, %s1240_s15   ;;  %p1805_p5 = scmp.ne.s32.totalorder %s1796_s28, 0 }
 0x4e6   : > { %p1806_p7 = scmp.ge.s32.totalorder %s1252_s18, 2  ;;  %s898_s26 = scalar_lea.sflag [#allocation4], %s897_s6 }
 0x4e8   : > { %p1050_p9 = pnand %p1806_p7, %p1805_p5 }
 0x4ea   : > { %1235 = dma.done.wait (!%p1050_p9), %s898_s26, 128  }
 0x4eb   : > { %1237 = vsyncadd (!%p1050_p9), %s898_s26, 4294967168  ;;  %p20_p11 = scmp.ge.s32.totalorder %s1313_s21, 4   ;;  %s1807_s15 = smov %s1244_s16 }
 0x4ec   : > { %s1808_s16 = smov %s1248_s17  ;;  %s1809_s17 = smov %s1325_s24 }
 0x4ed   : > { %s1810_s18 = smov %s1313_s21  ;;  %22 = sbr.rel (!%p20_p11) target bundleno = 7 (0x7), region = 94 }
 0x4f4   :  { %903 = vsyncpa [#allocation3], 1 }
 0x4f5   :  { %905 = vsyncpa [#allocation3 + $0x1], 1 }
 0x4f6   :  { %906 = vsyncpa [#allocation6], 1 }
 0x4f7   :  { %908 = vsyncpa [#allocation6 + $0x1], 1 }
 0x4f8   :  { %909 = vsyncpa [#allocation4], 1 }
 0x4f9   :  { %911 = vsyncpa [#allocation4 + $0x1], 1 }

</bundles_post_ra>
